<compile_context>
chip_gen: v5e
topology: v5e:2x2
jax: 0.10.0
libtpu: 0.0.40
codegen_flags: <defaults>
</compile_context>

<pallas_src>
import functools

import jax
import jax.numpy as jnp
from jax.experimental import pallas as pl
from jax.experimental.pallas import tpu as pltpu

_INV_SQRT2 = 0.7071067811865476
_LANE = 128
_CHUNK = 2048          # lane chunk for in-kernel f32 pooling / gated stores


def _cdiv(a, b):
    return -(-a // b)


def _round_up(v, m):
    return _cdiv(v, m) * m


def _gelu_exact(h):
    # Matches PyTorch nn.GELU() default (erf-based).
    return 0.5 * h * (1.0 + jax.lax.erf(h * _INV_SQRT2))


def _vmem_capacity_bytes():
    try:
        cap = getattr(pltpu.get_tpu_info(), "vmem_capacity_bytes", None)
        if cap:
            return int(cap)
    except Exception:
        pass
    return 64 << 20     # conservative fallback (v7x per-core VMEM)


def _pack_factor(C, HW, itemsize):
    """Largest power-of-2 k s.t. (C*k, HW/k) is a free reshape with full sublanes."""
    target = max(8, 32 // max(itemsize, 1))      # 8 (f32) / 16 (bf16) / 32 (int8)
    k = 1
    while (C * k * 2 <= target) and (HW % (k * 2) == 0) and (HW // (k * 2) >= _LANE):
        k *= 2
    return k


# ----------------------------------------------------------------------------
# Fused single-pass kernel: pool + 1x1 convs + GELU + sigmoid + multiply
# ----------------------------------------------------------------------------
def _fused_kernel(x_ref, w1t_ref, b1_ref, w2_ref, b2_ref, o_ref, *, hw, inv_hw):
    n_full = hw // _CHUNK
    rem = hw - n_full * _CHUNK

    # Global average pool: f32 accumulation over lane chunks (bounds temporaries
    # to one chunk instead of materializing an f32 copy of the whole slab).
    acc = jnp.zeros((x_ref.shape[0], 1), jnp.float32)
    if n_full > 0:
        def _sum_chunk(i, a):
            off = pl.multiple_of(i * _CHUNK, _CHUNK)
            return a + jnp.sum(x_ref[:, pl.ds(off, _CHUNK)].astype(jnp.float32),
                               axis=-1, keepdims=True)
        acc = jax.lax.fori_loop(0, n_full, _sum_chunk, acc)
    if rem > 0:
        acc = acc + jnp.sum(
            x_ref[:, pl.ds(n_full * _CHUNK, rem)].astype(jnp.float32),
            axis=-1, keepdims=True)

    # Gate math on VPU/XLU (no N=1 MXU matvecs).  Weights were pre-repeated over
    # the sublane packing factor, so the sublane reduction also sums the packed
    # sub-rows of each original channel.
    h = jnp.sum(w1t_ref[...] * (acc * inv_hw), axis=0, keepdims=True) + b1_ref[...]
    h = _gelu_exact(h)
    a = jnp.sum(w2_ref[...] * h, axis=-1, keepdims=True) + b2_ref[...]
    gate = jax.nn.sigmoid(a).astype(o_ref.dtype)              # (C_p, 1), x.dtype

    # Apply: chunked lane-dense stores straight from the resident input slab.
    if n_full > 0:
        def _store_chunk(i, carry):
            off = pl.multiple_of(i * _CHUNK, _CHUNK)
            o_ref[:, pl.ds(off, _CHUNK)] = x_ref[:, pl.ds(off, _CHUNK)] * gate
            return carry
        jax.lax.fori_loop(0, n_full, _store_chunk, 0)
    if rem > 0:
        o_ref[:, pl.ds(n_full * _CHUNK, rem)] = (
            x_ref[:, pl.ds(n_full * _CHUNK, rem)] * gate)


# ----------------------------------------------------------------------------
# Two-pass fallback kernels
# ----------------------------------------------------------------------------
def _pool_kernel(x_ref, psum_ref, *, hw, tile, n_tiles, per_split):
    t = pl.program_id(2)

    @pl.when(t == 0)
    def _():
        psum_ref[...] = jnp.zeros_like(psum_ref)

    def _accum(vals):
        psum_ref[...] += jnp.sum(vals, axis=-1, keepdims=True)

    rem = hw - (n_tiles - 1) * tile            # valid lanes in the last tile
    if rem == tile:                            # tile divides HW: no masking code
        _accum(x_ref[...].astype(jnp.float32))
    else:
        g = pl.program_id(1) * per_split + t   # global tile index
        is_last = g == (n_tiles - 1)

        @pl.when(jnp.logical_not(is_last))
        def _():
            _accum(x_ref[...].astype(jnp.float32))

        @pl.when(is_last)
        def _():
            # Mask the ragged tail (OOB lanes of the partial edge block are
            # unspecified and must not enter the mean).
            lane = jax.lax.broadcasted_iota(jnp.int32, x_ref.shape, 1)
            _accum(jnp.where(lane < rem, x_ref[...].astype(jnp.float32), 0.0))


def _apply_kernel(x_ref, gate_ref, o_ref):
    # Gate already comes in x.dtype: single native broadcast multiply + store.
    o_ref[...] = x_ref[...] * gate_ref[...]


# ----------------------------------------------------------------------------
# Wrapper
# ----------------------------------------------------------------------------
def channel_attention(x, w1, b1, w2, b2, *, donate_x=False,
                      force_two_pass=False, tile_bytes=None):
    """RCAN ChannelAttention forward.

    x: (B, C, H, W).  w1: (R, C), b1: (R, 1), w2: (C, R), b2: (C, 1).
    Returns x * sigmoid(conv2(gelu(conv1(mean_hw(x))))), same shape/dtype as x.
    """
    B, C, H, W = x.shape
    HW = H * W
    R = w1.shape[0]
    itemsize = jnp.dtype(x.dtype).itemsize

    # Small-C sublane packing: free row-major reshape of the slab.
    k = _pack_factor(C, HW, itemsize)
    C_p, HW2 = C * k, HW // k
    x_r = x.reshape(B, C_p, HW2)
    inv_hw = 1.0 / float(HW)

    vmem_cap = _vmem_capacity_bytes()
    vmem_budget = int(min(max(vmem_cap - (16 << 20), 24 << 20), 96 << 20))
    slab_bytes = C_p * HW2 * itemsize
    io_alias = {0: 0} if donate_x else {}

    # ------------------ fused single pass (2x HBM traffic) -------------------
    if (not force_two_pass) and (4 * slab_bytes + (4 << 20) <= vmem_budget):
        w1t = jnp.transpose(w1).astype(jnp.float32)                 # (C, R)
        w2f = jnp.reshape(w2, (C, R)).astype(jnp.float32)
        b2f = jnp.reshape(b2, (C, 1)).astype(jnp.float32)
        if k > 1:                                                   # tiny, host-side
            w1t = jnp.repeat(w1t, k, axis=0)
            w2f = jnp.repeat(w2f, k, axis=0)
            b2f = jnp.repeat(b2f, k, axis=0)
        b1_row = jnp.reshape(b1, (1, R)).astype(jnp.float32)

        out_r = pl.pallas_call(
            functools.partial(_fused_kernel, hw=HW2, inv_hw=inv_hw),
            out_shape=jax.ShapeDtypeStruct((B, C_p, HW2), x.dtype),
            grid_spec=pltpu.PrefetchScalarGridSpec(
                num_scalar_prefetch=0,
                grid=(B,),
                in_specs=[
                    pl.BlockSpec((None, C_p, HW2), lambda b: (b, 0, 0)),  # x slab
                    pl.BlockSpec((C_p, R), lambda b: (0, 0)),             # w1^T
                    pl.BlockSpec((1, R), lambda b: (0, 0)),               # b1 row
                    pl.BlockSpec((C_p, R), lambda b: (0, 0)),             # w2
                    pl.BlockSpec((C_p, 1), lambda b: (0, 0)),             # b2
                ],
                out_specs=pl.BlockSpec((None, C_p, HW2), lambda b: (b, 0, 0)),
            ),
            compiler_params=pltpu.CompilerParams(
                dimension_semantics=("parallel",),
                vmem_limit_bytes=vmem_budget),
            input_output_aliases=io_alias,
        )(x_r, w1t, b1_row, w2f, b2f)
        return out_r.reshape(B, C, H, W)

    # ------------------ two-pass fallback -------------------------------------
    # Generation-aware lane tile (~8 MiB on 64 MiB-VMEM parts, ~16 MiB on 128 MiB).
    tgt = tile_bytes if tile_bytes is not None else (
        (8 << 20) if vmem_cap <= (64 << 20) else (16 << 20))
    tgt = min(tgt, vmem_budget // 5)
    max_t = max(_LANE, (tgt // max(C_p * itemsize, 1)) // _LANE * _LANE)
    T = min(_round_up(HW2, _LANE), max_t)
    n_t = _cdiv(HW2, T)
    # v7x megacore: split the HW reduction over both TensorCores when B == 1.
    n_split = 2 if (B == 1 and n_t >= 2 and n_t % 2 == 0) else 1
    per_split = n_t // n_split

    # Pass 1: partial per-channel sums (f32); reduction axis innermost/arbitrary.
    psum = pl.pallas_call(
        functools.partial(_pool_kernel, hw=HW2, tile=T, n_tiles=n_t,
                          per_split=per_split),
        out_shape=jax.ShapeDtypeStruct((B, n_split, C_p, 1), jnp.float32),
        grid_spec=pltpu.PrefetchScalarGridSpec(
            num_scalar_prefetch=0,
            grid=(B, n_split, per_split),
            in_specs=[pl.BlockSpec(
                (None, C_p, T), lambda b, s, t: (b, 0, s * per_split + t))],
            out_specs=pl.BlockSpec(
                (None, None, C_p, 1), lambda b, s, t: (b, s, 0, 0)),
        ),
        compiler_params=pltpu.CompilerParams(
            dimension_semantics=("parallel", "parallel", "arbitrary"),
            vmem_limit_bytes=vmem_budget),
    )(x_r)

    # Tiny XLA epilogue on (B, C): finish the mean, 1x1 convs, GELU, sigmoid.
    sums = jnp.sum(psum, axis=1)[..., 0]                        # (B, C_p)
    if k > 1:
        sums = sums.reshape(B, C, k).sum(axis=-1)               # (B, C)
    pooled = sums * inv_hw
    h = pooled @ jnp.transpose(w1).astype(jnp.float32) \
        + jnp.reshape(b1, (1, R)).astype(jnp.float32)
    h = _gelu_exact(h)
    a = h @ jnp.transpose(w2).astype(jnp.float32) \
        + jnp.reshape(b2, (1, C)).astype(jnp.float32)
    gate = jax.nn.sigmoid(a)
    if k > 1:
        gate = jnp.repeat(gate, k, axis=1)                      # (B, C_p)
    gate = gate[..., None].astype(x.dtype)                      # (B, C_p, 1)

    # Pass 2: lane-dense broadcast multiply; both grid axes parallel; the ragged
    # edge block relies on Pallas discarding out-of-bounds writes.
    out_r = pl.pallas_call(
        _apply_kernel,
        out_shape=jax.ShapeDtypeStruct((B, C_p, HW2), x.dtype),
        grid_spec=pltpu.PrefetchScalarGridSpec(
            num_scalar_prefetch=0,
            grid=(B, n_t),
            in_specs=[pl.BlockSpec((None, C_p, T), lambda b, t: (b, 0, t)),
                      pl.BlockSpec((None, C_p, 1), lambda b, t: (b, 0, 0))],
            out_specs=pl.BlockSpec((None, C_p, T), lambda b, t: (b, 0, t)),
        ),
        compiler_params=pltpu.CompilerParams(
            dimension_semantics=("parallel", "parallel"),
            vmem_limit_bytes=vmem_budget),
        input_output_aliases=io_alias,
    )(x_r, gate)
    return out_r.reshape(B, C, H, W)


# ----------------------------------------------------------------------------
# Pure-JAX reference + self-test
# ----------------------------------------------------------------------------
def _reference(x, w1, b1, w2, b2):
    pooled = x.astype(jnp.float32).mean(axis=(2, 3))                     # (B, C)
    h = pooled @ w1.astype(jnp.float32).T + b1.reshape(1, -1).astype(jnp.float32)
    h = _gelu_exact(h)
    a = jax.nn.sigmoid(h @ w2.astype(jnp.float32).T
                       + b2.reshape(1, -1).astype(jnp.float32))          # (B, C)
    return x * a[:, :, None, None].astype(x.dtype)


if __name__ == "__main__":
    def _run_case(B, C, H, W, reduction, key, **kw):
        R = max(C // reduction, 1)
        ks = jax.random.split(key, 5)
        x = jax.random.normal(ks[0], (B, C, H, W), dtype=jnp.float32)
        w1 = jax.random.normal(ks[1], (R, C), dtype=jnp.float32) * 0.5
        b1 = jax.random.normal(ks[2], (R, 1), dtype=jnp.float32) * 0.1
        w2 = jax.random.normal(ks[3], (C, R), dtype=jnp.float32) * 0.5
        b2 = jax.random.normal(ks[4], (C, 1), dtype=jnp.float32) * 0.1
        out = jax.block_until_ready(channel_attention(x, w1, b1, w2, b2, **kw))
        ref = _reference(x, w1, b1, w2, b2)
        assert out.shape == x.shape and out.dtype == x.dtype
        assert jnp.allclose(out, ref, atol=1e-5, rtol=1e-4), \
            f"mismatch vs reference for case {(B, C, H, W)}"

    keys = jax.random.split(jax.random.PRNGKey(0), 5)
    # Fused single-pass path: packing, unaligned HW, chunked pooling + tail.
    _run_case(2, 4, 16, 16, 16, keys[0])                  # packed view (8, 128)
    _run_case(1, 8, 10, 10, 4, keys[1])                   # HW=100 (unaligned)
    _run_case(1, 8, 50, 50, 4, keys[2])                   # chunk loop + ragged tail
    # Two-pass fallback (forced): masked ragged tiles, partial edge blocks,
    # two-core reduction split at B==1, XLA gate epilogue, small-C packing.
    _run_case(1, 4, 20, 20, 4, keys[3], force_two_pass=True, tile_bytes=4096)
    _run_case(2, 8, 40, 40, 4, keys[4], force_two_pass=True, tile_bytes=4096)
    print("KERNEL_OK")
</pallas_src>

<mosaic_0001>
module attributes {stable_mosaic.version = 11 : i64} {
  func.func @_fused_kernel(%arg0: i32, %arg1: memref<1x8x128xf32, #tpu.memory_space<vmem>>, %arg2: memref<8x1xf32, #tpu.memory_space<vmem>>, %arg3: memref<1x1xf32, #tpu.memory_space<vmem>>, %arg4: memref<8x1xf32, #tpu.memory_space<vmem>>, %arg5: memref<8x1xf32, #tpu.memory_space<vmem>>, %arg6: memref<1x8x128xf32, #tpu.memory_space<vmem>>) attributes {dimension_semantics = [#tpu.dimension_semantics<parallel>], iteration_bounds = array<i64: 2>, scalar_prefetch = 0 : i64, scratch_operands = 0 : i64, tpu.core_type = #tpu.core_type<tc>, window_params = [{transform_indices = @transform_0, window_bounds = array<i64: 1, 8, 128>}, {pipeline_mode = #tpu.pipeline_mode<synchronous>, transform_indices = @transform_1, window_bounds = array<i64: 8, 1>}, {pipeline_mode = #tpu.pipeline_mode<synchronous>, transform_indices = @transform_2, window_bounds = array<i64: 1, 1>}, {pipeline_mode = #tpu.pipeline_mode<synchronous>, transform_indices = @transform_3, window_bounds = array<i64: 8, 1>}, {pipeline_mode = #tpu.pipeline_mode<synchronous>, transform_indices = @transform_4, window_bounds = array<i64: 8, 1>}, {transform_indices = @transform_5, window_bounds = array<i64: 1, 8, 128>}]} {
    %cst = arith.constant 0.000000e+00 : f32
    %0 = vector.broadcast %cst : f32 to vector<8x1xf32>
    %c0 = arith.constant 0 : index
    %c0_0 = arith.constant 0 : index
    %c0_1 = arith.constant 0 : index
    %1 = vector.load %arg1[%c0, %c0_0, %c0_1] : memref<1x8x128xf32, #tpu.memory_space<vmem>>, vector<1x8x128xf32>
    %2 = vector.shape_cast %1 : vector<1x8x128xf32> to vector<8x128xf32>
    %cst_2 = arith.constant dense<0.000000e+00> : vector<8xf32>
    %3 = vector.multi_reduction <add>, %2, %cst_2 [1] : vector<8x128xf32> to vector<8xf32>
    %4 = vector.shape_cast %3 : vector<8xf32> to vector<8x1xf32>
    %5 = arith.addf %0, %4 : vector<8x1xf32>
    %c0_3 = arith.constant 0 : index
    %c0_4 = arith.constant 0 : index
    %6 = vector.load %arg2[%c0_3, %c0_4] : memref<8x1xf32, #tpu.memory_space<vmem>>, vector<8x1xf32>
    %cst_5 = arith.constant 3.906250e-03 : f32
    %7 = vector.broadcast %cst_5 : f32 to vector<8x1xf32>
    %8 = arith.mulf %5, %7 : vector<8x1xf32>
    %9 = arith.mulf %6, %8 : vector<8x1xf32>
    %cst_6 = arith.constant dense<0.000000e+00> : vector<1xf32>
    %10 = vector.multi_reduction <add>, %9, %cst_6 [0] : vector<8x1xf32> to vector<1xf32>
    %11 = vector.shape_cast %10 : vector<1xf32> to vector<1x1xf32>
    %c0_7 = arith.constant 0 : index
    %c0_8 = arith.constant 0 : index
    %12 = vector.load %arg3[%c0_7, %c0_8] : memref<1x1xf32, #tpu.memory_space<vmem>>, vector<1x1xf32>
    %13 = arith.addf %11, %12 : vector<1x1xf32>
    %cst_9 = arith.constant 5.000000e-01 : f32
    %14 = vector.broadcast %cst_9 : f32 to vector<1x1xf32>
    %15 = arith.mulf %14, %13 : vector<1x1xf32>
    %cst_10 = arith.constant 0.707106769 : f32
    %16 = vector.broadcast %cst_10 : f32 to vector<1x1xf32>
    %17 = arith.mulf %13, %16 : vector<1x1xf32>
    %18 = math.erf %17 : vector<1x1xf32>
    %cst_11 = arith.constant 1.000000e+00 : f32
    %19 = vector.broadcast %cst_11 : f32 to vector<1x1xf32>
    %20 = arith.addf %19, %18 : vector<1x1xf32>
    %21 = arith.mulf %15, %20 : vector<1x1xf32>
    %c0_12 = arith.constant 0 : index
    %c0_13 = arith.constant 0 : index
    %22 = vector.load %arg4[%c0_12, %c0_13] : memref<8x1xf32, #tpu.memory_space<vmem>>, vector<8x1xf32>
    %23 = vector.broadcast %21 : vector<1x1xf32> to vector<8x1xf32>
    %24 = arith.mulf %22, %23 : vector<8x1xf32>
    %cst_14 = arith.constant dense<0.000000e+00> : vector<8xf32>
    %25 = vector.multi_reduction <add>, %24, %cst_14 [1] : vector<8x1xf32> to vector<8xf32>
    %26 = vector.shape_cast %25 : vector<8xf32> to vector<8x1xf32>
    %c0_15 = arith.constant 0 : index
    %c0_16 = arith.constant 0 : index
    %27 = vector.load %arg5[%c0_15, %c0_16] : memref<8x1xf32, #tpu.memory_space<vmem>>, vector<8x1xf32>
    %28 = arith.addf %26, %27 : vector<8x1xf32>
    %29 = arith.negf %28 : vector<8x1xf32>
    %30 = math.exp %29 : vector<8x1xf32>
    %cst_17 = arith.constant 1.000000e+00 : f32
    %31 = vector.broadcast %cst_17 : f32 to vector<8x1xf32>
    %32 = arith.addf %31, %30 : vector<8x1xf32>
    %33 = arith.divf %31, %32 : vector<8x1xf32>
    %c0_18 = arith.constant 0 : index
    %c0_19 = arith.constant 0 : index
    %c0_20 = arith.constant 0 : index
    %34 = vector.load %arg1[%c0_18, %c0_19, %c0_20] : memref<1x8x128xf32, #tpu.memory_space<vmem>>, vector<1x8x128xf32>
    %35 = vector.shape_cast %34 : vector<1x8x128xf32> to vector<8x128xf32>
    %36 = vector.broadcast %33 : vector<8x1xf32> to vector<8x128xf32>
    %37 = arith.mulf %35, %36 : vector<8x128xf32>
    %c0_21 = arith.constant 0 : index
    %c0_22 = arith.constant 0 : index
    %c0_23 = arith.constant 0 : index
    %38 = vector.load %arg6[%c0_21, %c0_22, %c0_23] : memref<1x8x128xf32, #tpu.memory_space<vmem>>, vector<1x8x128xf32>
    %39 = vector.shape_cast %38 : vector<1x8x128xf32> to vector<8x128xf32>
    %40 = vector.shape_cast %37 : vector<8x128xf32> to vector<1x8x128xf32>
    tpu.vector_store %arg6[%c0_21, %c0_22, %c0_23], %40 {strides = array<i32>} : memref<1x8x128xf32, #tpu.memory_space<vmem>>, vector<1x8x128xf32>,
    return
  }
  func.func @transform_0(%arg0: i32) -> (i32, i32, i32) {
    %c0_i32 = arith.constant 0 : i32
    %c0_i32_0 = arith.constant 0 : i32
    %c0_i32_1 = arith.constant 0 : i32
    return %arg0, %c0_i32, %c0_i32_0 : i32, i32, i32
  }
  func.func @transform_1(%arg0: i32) -> (i32, i32) {
    %c0_i32 = arith.constant 0 : i32
    %c0_i32_0 = arith.constant 0 : i32
    %c0_i32_1 = arith.constant 0 : i32
    return %c0_i32, %c0_i32_0 : i32, i32
  }
  func.func @transform_2(%arg0: i32) -> (i32, i32) {
    %c0_i32 = arith.constant 0 : i32
    %c0_i32_0 = arith.constant 0 : i32
    %c0_i32_1 = arith.constant 0 : i32
    return %c0_i32, %c0_i32_0 : i32, i32
  }
  func.func @transform_3(%arg0: i32) -> (i32, i32) {
    %c0_i32 = arith.constant 0 : i32
    %c0_i32_0 = arith.constant 0 : i32
    %c0_i32_1 = arith.constant 0 : i32
    return %c0_i32, %c0_i32_0 : i32, i32
  }
  func.func @transform_4(%arg0: i32) -> (i32, i32) {
    %c0_i32 = arith.constant 0 : i32
    %c0_i32_0 = arith.constant 0 : i32
    %c0_i32_1 = arith.constant 0 : i32
    return %c0_i32, %c0_i32_0 : i32, i32
  }
  func.func @transform_5(%arg0: i32) -> (i32, i32, i32) {
    %c0_i32 = arith.constant 0 : i32
    %c0_i32_0 = arith.constant 0 : i32
    %c0_i32_1 = arith.constant 0 : i32
    return %arg0, %c0_i32, %c0_i32_0 : i32, i32, i32
  }
}

</mosaic_0001>

<bundles_post_ra>
// kernel: tpu_custom_call.1
= control target key start
LH: loop header
LB: loop body
LE: loop exit
PB: predicated region body
PF: predicated region fallthrough
CT: control target
= control target key end

     0   :  { %s645_s0 = inlined_call_operand.vmem [shape: f32[2,8,128], index: 0, kind: input, shape index: {}]   ;;  %s646_s1 = inlined_call_operand.vmem [shape: f32[8,1], index: 1, kind: input, shape index: {}]   ;;  %s647_s2 = inlined_call_operand.<no memory space> [shape: f32[1,1], index: 2, kind: input, shape index: {}]   ;;  %s648_s3 = inlined_call_operand.vmem [shape: f32[8,1], index: 3, kind: input, shape index: {}]   ;;  %s649_s4 = inlined_call_operand.vmem [shape: f32[8,1], index: 4, kind: input, shape index: {}]   ;;  %s650_s5 = inlined_call_operand.hbm [shape: f32[2,8,128], index: 5, kind: output, shape index: {}]  }
   0x1   :  { %v10_v0 = vstv %s647_s2 }
   0x2   :  { %11 = vst [vmem:[#allocation2] sm:$0x1] %v10_v0 }
   0x3   :  { %12 = vsyncpa [#allocation4], 0 }
   0x4   :  { %14 = vsyncpa [#allocation4 + $0x1], 0  ;;  %s547_s20 = smov 0   ;;  %s549_s21 = smov 0  }
   0x5   :  { %s551_s22 = smov 0   ;;  %s553_s23 = smov 0  }
   0x6 LB: > { %s568_s2 = sadd.s32 4294967295, %s511_s23   ;;  %s390_s24 = sadd.s32 4294967294, %s511_s23   ;;  %s511_s23 = sphi %s553_s23, %s656_s23   ;;  %s507_s22 = sphi %s551_s22, %s655_s22   ;;  %s503_s21 = sphi %s549_s21, %s654_s21   ;;  %s499_s20 = sphi %s547_s20, %s653_s20  }
   0x7   : > { %s572_s25 = sadd.s32 1, %s511_s23   ;;  %s137_s26 = sadd.s32 1, %s507_s22 }
   0x8   : > { %s134_s27 = ssub.s32 %s511_s23, %s572_s25  ;;  %p147_p0 = scmp.ne.s32.totalorder %s507_s22, %s503_s21 }
   0x9   : > { %p135_p1 = scmp.eq.s32.totalorder %s134_s27, 0  ;;  %p148_p2 = scmp.eq.s32.totalorder %s568_s2, 1 }
   0xa   : > { %p153_p3 = scmp.ne.s32.totalorder %s503_s21, %s499_s20  ;;  %p154_p4 = scmp.eq.s32.totalorder %s390_s24, 1 }
   0xb   : > { %s583_s28 = scalar_select %p135_p1, %s507_s22, %s137_s26  }
   0xc   : > { %p585_p5 = por %p148_p2, %p147_p0  ;;  %p589_p6 = por %p154_p4, %p153_p3 }
   0xd   : > { %p393_p7 = scmp.ge.s32.totalorder %s511_s23, 1  ;;  %p191_p8 = scmp.lt.s32.totalorder %s511_s23, 3 }
   0xf   : > { %p192_p9 = pnand %p393_p7, %p191_p8 }
  0x10   : > { %p218_p10 = scmp.lt.s32.totalorder (!%p192_p9), %s568_s2, 1  ;;  %s215_s17 = sand.u32 (!%p192_p9), 1, %s503_s21  }
  0x11   : > { %195 = sbr.rel (%p192_p9) target bundleno = 367 (0x16f), region = 40  ;;  %s394_s18 = sshll.u32 (!%p192_p9), %s215_s17, 3 }
  0x12   : > { %s399_s19 = sshll.u32 (!%p192_p9), %s568_s2, 3  ;;  %s316_s9 = scalar_lea.sflag (!%p192_p9), [#allocation4], %s215_s17 }
  0x13   : > { %s326_s27 = scalar_lea.hbm (!%p192_p9), %s650_s5, %s399_s19  ;;  %s469_s13 = scalar_lea.hbm (!%p192_p9), %s650_s5, 16 }
  0x14   : > { %s330_s8 = sshll.u32 (!%p192_p9), %s326_s27, 4  ;;  %s331_s8 = int_to_ptr.hbm [resolvable:$true] %s330_s8 }
  0x16   : > { %s219_s6 = scalar_select %p218_p10, %s568_s2, 1  ;;  %v226_v2 = vld [vmem:[%s646_s1] sm:$0xff]  ;;  %vm229_vm0 = vcmask 7168   ;;  %v513_v33 = vmov 0  }
  0x17   : > { %v237_v12 = vld [vmem:[#allocation2] sm:$0x1]  ;;  %442 = vset.pattern.permute.xlu0 %v513_v33 }
  0x18   : > { %s395_s7 = sshll.u32 %s219_s6, 3  ;;  %v283_v55 = vld [vmem:[%s648_s3] sm:$0xff]  ;;  %s217_s6 = scalar_lea.vmem [#allocation3], %s394_s18 }
  0x19   : > { %s221_s10 = scalar_lea.vmem %s645_s0, %s395_s7  ;;  %v287_v57 = vld [vmem:[%s649_s4] sm:$0xff]  ;;  %s328_s7 = sshll.u32 %s217_s6, 4  ;;  %s329_s7 = int_to_ptr.vmem [resolvable:$true] %s328_s7 }
  0x1a   : > { %v600_v1 = vld [vmem:[%s221_s10] sm:$0xff]  ;;  %s463_s10 = sshra.s32 %s331_s8, 4  ;;  %s464_s10 = int_to_ptr.hbm [resolvable:$true] %s463_s10 }
  0x1b   : > { %223 = vadd.xlane.f32.xlu0 %v600_v1  ;;  %s465_s11 = scalar_lea.hbm %s464_s10, 8  ;;  %p470_p0 = scmp.lt.s32.totalorder %s464_s10, %s650_s5 }
  0x1c   : > { %p466_p11 = scmp.ne.s32.totalorder %s464_s10, %s465_s11  ;;  %p471_p1 = scmp.lt.s32.totalorder %s469_s13, %s465_s11 }
  0x1e   : > { %p467_p12 = pnand %p466_p11, %p585_p5  ;;  %p472_p2 = por %p471_p1, %p470_p0 }
  0x20   : > { %p468_p13 = pneg %p467_p12 }
  0x22   : > { %p473_p3 = pnand %p472_p2, %p468_p13 }
  0x8e   : > { %v224_v3 = vpop.xlane.xlu0 %223 }
  0x8f   : > { %v227_v4 = vmul.f32 0.00390625, %v224_v3 }
  0x91   : > { %v228_v5 = vmul.f32 %v227_v4, %v226_v2 }
  0x93   : > { %v230_v6 = vsel %vm229_vm0, %v228_v5, 0.0 }
  0x94   : > { %v231_v7 = vrot.slane %v230_v6, 4 }
  0x96   : > { %v232_v8 = vadd.f32 %v231_v7, %v230_v6 }
  0x98   : > { %v233_v9 = vrot.slane %v232_v8, 2 }
  0x9a   : > { %v234_v10 = vadd.f32 %v233_v9, %v232_v8 }
  0x9c   : > { %v235_v11 = vrot.slane %v234_v10, 1 }
  0x9e   : > { %v236_v13 = vadd.f32 %v235_v11, %v234_v10 }
  0xa0   : > { %v238_v14 = vadd.f32 %v237_v12, %v236_v13 }
  0xa2   : > { %v240_v15 = vmul.f32 0.70710677, %v238_v14  ;;  %v239_v52 = vmul.f32 0.5, %v238_v14 }
  0xa4   : > { %v241_v16 = vmul.f32 %v240_v15, %v240_v15 }
  0xa6   : > { %v242_v17 = vmin.f32 %v241_v16, 16.0 }
  0xa8   : > { %v243_v18 = vmul.f32 2.1237322e-06, %v242_v17  ;;  %v254_v19 = vmul.f32 3.8918573e-05, %v242_v17 }
  0xaa   : > { %v244_v20 = vadd.f32 0.00028619796, %v243_v18  ;;  %v255_v21 = vadd.f32 0.001143296, %v254_v19 }
  0xac   : > { %v245_v22 = vmul.f32 %v244_v20, %v242_v17  ;;  %v256_v23 = vmul.f32 %v255_v21, %v242_v17 }
  0xae   : > { %v257_v24 = vadd.f32 0.014752088, %v256_v23  ;;  %v246_v25 = vadd.f32 0.0036580483, %v245_v22 }
  0xb0   : > { %v258_v26 = vmul.f32 %v257_v24, %v242_v17  ;;  %v247_v28 = vmul.f32 %v246_v25, %v242_v17 }
  0xb2   : > { %v259_v27 = vadd.f32 0.112945676, %v258_v26  ;;  %v248_v31 = vadd.f32 0.05243302, %v247_v28 }
  0xb4   : > { %v260_v29 = vmul.f32 %v259_v27, %v242_v17  ;;  %v249_v35 = vmul.f32 %v248_v31, %v242_v17 }
  0xb6   : > { %v261_v30 = vadd.f32 0.4994258, %v260_v29  ;;  %v250_v36 = vadd.f32 0.18741608, %v249_v35 }
  0xb8   : > { %v262_v32 = vmul.f32 %v261_v30, %v242_v17  ;;  %v251_v38 = vmul.f32 %v250_v36, %v242_v17 }
  0xba   : > { %v263_v34 = vadd.f32 1.0, %v262_v32  ;;  %v252_v42 = vadd.f32 1.1283791, %v251_v38 }
  0xbc   : > { %443 = vrcp.f32 %v263_v34  ;;  %v275_v41 = vand.u32 2147483648, %v263_v34  ;;  %v273_v44 = vand.u32 2147483647, %v263_v34  ;;  %vm269_vm2 = vweird.f32 %v263_v34 }
  0xbd   : > { %v253_v47 = vmul.f32 %v252_v42, %v240_v15 }
  0xbe   : > { %v276_v46 = vor.u32 1.1754944e-38, %v275_v41  ;;  %vm274_vm4 = vcmp.eq.f32.partialorder %v273_v44, 8.507059e+37 }
  0xc2   : > { %v444_v37 = vpop.eup %443 }
  0xc3   : > { %v265_v39 = vmul.f32 %v444_v37, %v263_v34  ;;  %vm270_vm1 = vweird.f32 %v444_v37 }
  0xc4   : > { %vm271_vm3 = vmor %vm269_vm2, %vm270_vm1 }
  0xc5   : > { %v266_v40 = vsub.f32 1.0, %v265_v39 }
  0xc7   : > { %v267_v43 = vmul.f32 %v444_v37, %v266_v40 }
  0xc9   : > { %v268_v45 = vadd.f32 %v444_v37, %v267_v43 }
  0xcb   : > { %v272_v48 = vsel %vm271_vm3, %v444_v37, %v268_v45 }
  0xcc   : > { %v277_v49 = vsel %vm274_vm4, %v276_v46, %v272_v48 }
  0xcd   : > { %v278_v50 = vmul.f32 %v277_v49, %v253_v47 }
  0xcf   : > { %v396_v51 = vclamps-f32 %v278_v50, 1.0 }
  0xd1   : > { %v281_v53 = vadd.f32 1.0, %v396_v51 }
  0xd3   : > { %v282_v54 = vmul.f32 %v281_v53, %v239_v52 }
  0xd5   : > { %v284_v56 = vperm.slane %v282_v54, 0 }
  0xd7   : > { %v285_v58 = vmul.f32 %v284_v56, %v283_v55 }
  0xd9   : > { %v288_v59 = vadd.f32 %v287_v57, %v285_v58 }
  0xdb   : > { %v397_v60 = vmul.f32 -1.442695, %v288_v59 }
  0xdd   : > { %445 = vpow2.f32 %v397_v60 }
  0xe3   : > { %v446_v61 = vpop.eup %445 }
  0xe4   : > { %v292_v62 = vadd.f32 1.0, %v446_v61 }
  0xe6   : > { %447 = vrcp.f32 %v292_v62  ;;  %v304_v3 = vand.u32 2147483648, %v292_v62  ;;  %v302_v5 = vand.u32 2147483647, %v292_v62  ;;  %vm298_vm6 = vweird.f32 %v292_v62 }
  0xe8   : > { %v305_v7 = vor.u32 1.1754944e-38, %v304_v3  ;;  %vm303_vm8 = vcmp.eq.f32.partialorder %v302_v5, 8.507059e+37 }
  0xec   : > { %v448_v63 = vpop.eup %447 }
  0xed   : > { %v294_v0 = vmul.f32 %v448_v63, %v292_v62  ;;  %vm299_vm5 = vweird.f32 %v448_v63 }
  0xee   : > { %vm300_vm7 = vmor %vm298_vm6, %vm299_vm5 }
  0xef   : > { %v295_v2 = vsub.f32 1.0, %v294_v0 }
  0xf1   : > { %v296_v4 = vmul.f32 %v448_v63, %v295_v2 }
  0xf3   : > { %v297_v6 = vadd.f32 %v448_v63, %v296_v4 }
  0xf5   : > { %v301_v8 = vsel %vm300_vm7, %v448_v63, %v297_v6 }
  0xf6   : > { %v306_v9 = vsel %vm303_vm8, %v305_v7, %v301_v8 }
  0xf7   : > { %310 = vperm.xlu0 %442, %v306_v9  }
 0x169   : > { %v311_v10 = vpop.permute.xlu0 %310 }
 0x16a   : > { %v313_v11 = vmul.f32 %v311_v10, %v600_v1 }
 0x16c   : > { %314 = vst [vmem:[%s217_s6] sm:$0xff] %v313_v11 }
 0x16d   : > { %476 = shalt.err (!%p473_p3)
}
 0x16e   : > { %402 = dma.vmem_to_hbm [thread:$0]  (%p585_p5), %s329_s7, 128, %s331_s8, %s316_s9  }
 0x16f PF: > { %p408_p4 = scmp.ge.s32.totalorder %s511_s23, 2  ;;  %s342_s16 = sand.u32 1, %s499_s20  }
 0x170   : > { %s343_s17 = scalar_lea.sflag [#allocation4], %s342_s16 }
 0x171   : > { %p405_p7 = pnand %p408_p4, %p589_p6 }
 0x173   : > { %p406_p8 = pneg %p405_p7 }
 0x175   : > { %494 = dma.done.wait (%p406_p8), %s343_s17, 128  }
 0x176   : > { %496 = vsyncadd (%p406_p8), %s343_s17, 4294967168  ;;  %p17_p9 = scmp.ge.s32.totalorder %s572_s25, 4   ;;  %s653_s20 = smov %s503_s21 }
 0x177   : > { %s654_s21 = smov %s507_s22  ;;  %s655_s22 = smov %s583_s28 }
 0x178   : > { %s656_s23 = smov %s572_s25  ;;  %19 = sbr.rel (!%p17_p9) target bundleno = 6 (0x6), region = 75 }
 0x17d   :  { %349 = vsyncpa [#allocation4], 1 }
 0x17e   :  { %351 = vsyncpa [#allocation4 + $0x1], 1 }

</bundles_post_ra>
